<compile_context>
chip_gen: v7x
topology: tpu7x:2x2x1
jax: 0.10.0
libtpu: 0.0.40
codegen_flags: <defaults>
</compile_context>

<pallas_src>
import jax
import jax.numpy as jnp
from jax.experimental import pallas as pl
from jax.experimental.pallas import tpu as pltpu


def _server_kernel(x_ref, w_ref, b_ref, o_ref, acc_ref):
    # x_ref:   (TB, TD) VMEM        w_ref: (1, TD) VMEM
    # b_ref:   (1,) f32 SMEM        o_ref: (1, 1, TB) f32 VMEM (lane-dense)
    # acc_ref: (1, 1, TB) f32 VMEM scratch (persists across the k axis)
    k = pl.program_id(1)

    @pl.when(k == 0)
    def _init():
        acc_ref[...] = jnp.zeros_like(acc_ref)

    x = x_ref[...].astype(jnp.float32)
    w = w_ref[...].astype(jnp.float32)
    # VPU broadcast-multiply + XLU lane reduce; f32 accumulation in VMEM scratch.
    acc_ref[...] += jnp.sum(x * w, axis=-1).reshape(acc_ref.shape)

    @pl.when(k == pl.num_programs(1) - 1)
    def _finalize():
        logits = acc_ref[...] + b_ref[0]
        o_ref[...] = jax.nn.sigmoid(logits).astype(o_ref.dtype)


def _round_up(x, m):
    return ((x + m - 1) // m) * m


def _choose_tiles(B, D, per_buffer_bytes=8 * 1024 * 1024):
    """Pick (batch_tile, feature_tile) sized by VMEM bytes, not element counts.

    Byte math uses the lane-padded width round_up(D, 128) (what the tile
    actually occupies in VMEM).  ~8 MiB per x buffer double-buffers to ~16 MiB,
    well under the 32 MiB scoped limit we request, on every generation
    (v5e/v6e: 128 MiB physical, v7x: 64 MiB physical).
    """
    d_pad = _round_up(D, 128)
    # Rows per x buffer at full-D width, multiple of 128 (lane-dense output,
    # (8,128)-friendly blocks).
    tb = (per_buffer_bytes // (d_pad * 4)) // 128 * 128
    td = D
    if tb < 128:
        # Wide-D case: tile the feature axis (inner "arbitrary" grid axis) so
        # the batch tile can stay at least 128 rows.
        tb = 128
        if D % 128 == 0:
            td = min(D, max(128, (per_buffer_bytes // (tb * 4)) // 128 * 128))
            while D % td:          # td must divide D (no garbage tail columns
                td -= 128          # entering the reduction)
        # TODO(synk): non-128-aligned very wide D would need a masked tail
        # k-tile; fall back to a single oversized full-D tile in that case.
    if B <= tb:
        tb = B  # single full-extent batch block (always (8,128)-legal)
    else:
        # Ensure >= 2 batch tiles so the "parallel" axis feeds both v7x cores.
        tb = min(tb, max(128, _round_up((B + 1) // 2, 128)))
    return tb, td


def server_model_forward(x, w, b, *, tb=None, td=None):
    """sigmoid(x @ w.T + b) — matches ServerModel.forward.

    x: (B, D) f32, w: (1, D) f32 (PyTorch nn.Linear weight layout), b: (1,) f32.
    Returns (B, 1) f32.
    """
    B, D = x.shape
    auto_tb, auto_td = _choose_tiles(B, D)
    if tb is None:
        tb = auto_tb
    if td is None:
        td = auto_td
    nb = pl.cdiv(B, tb)   # batch tiles ("parallel"); last may be a remainder block
    nk = pl.cdiv(D, td)   # feature tiles ("arbitrary", reduction axis last)

    out_slab = pl.pallas_call(
        _server_kernel,
        out_shape=jax.ShapeDtypeStruct((nb, 1, tb), jnp.float32),
        grid=(nb, nk),
        in_specs=[
            pl.BlockSpec((tb, td), lambda i, k: (i, k)),            # streamed x tile
            pl.BlockSpec((1, td), lambda i, k: (0, k)),             # weight slice
            pl.BlockSpec(memory_space=pltpu.MemorySpace.SMEM),      # scalar bias
        ],
        out_specs=pl.BlockSpec((1, 1, tb), lambda i, k: (i, 0, 0)),  # lane-dense row
        scratch_shapes=[pltpu.VMEM((1, 1, tb), jnp.float32)],        # f32 accumulator
        compiler_params=pltpu.CompilerParams(
            dimension_semantics=("parallel", "arbitrary"),
            vmem_limit_bytes=32 * 1024 * 1024,
        ),
    )(x, w, b)

    # Tile-major flatten: remainder rows of the last batch tile (if any) hold
    # garbage sigmoids that land past index B-1 and are sliced off here.
    return out_slab.reshape(-1)[:B].reshape(B, 1)


def init_params(key, input_size):
    # Deterministic init matching nn.Linear default: U(-1/sqrt(in), 1/sqrt(in)).
    kw, kb = jax.random.split(key)
    bound = 1.0 / float(input_size) ** 0.5
    w = jax.random.uniform(kw, (1, input_size), jnp.float32, -bound, bound)
    b = jax.random.uniform(kb, (1,), jnp.float32, -bound, bound)
    return w, b


if __name__ == "__main__":
    key = jax.random.PRNGKey(0)
    kx, kp, kx2 = jax.random.split(key, 3)

    # Small shapes consistent with the module (batch=8, input_size=32).
    batch, input_size = 8, 32
    x = jax.random.normal(kx, (batch, input_size), jnp.float32)
    w, b = init_params(kp, input_size)

    out = server_model_forward(x, w, b)
    jax.block_until_ready(out)

    ref = jax.nn.sigmoid(x @ w.T + b)
    assert out.shape == (batch, 1)
    assert jnp.allclose(out, ref, atol=1e-5), "mismatch vs reference (small)"

    # Exercise the multi-tile + remainder-block path (B not a multiple of TB).
    batch2 = 300
    x2 = jax.random.normal(kx2, (batch2, input_size), jnp.float32)
    out2 = server_model_forward(x2, w, b, tb=128)
    jax.block_until_ready(out2)
    ref2 = jax.nn.sigmoid(x2 @ w.T + b)
    assert out2.shape == (batch2, 1)
    assert jnp.allclose(out2, ref2, atol=1e-5), "mismatch vs reference (tiled)"

    print("KERNEL_OK")
</pallas_src>

<mosaic_0001>
module attributes {stable_mosaic.version = 11 : i64} {
  func.func @_server_kernel(%arg0: i32, %arg1: i32, %arg2: memref<8x32xf32, #tpu.memory_space<vmem>>, %arg3: memref<1x32xf32, #tpu.memory_space<vmem>>, %arg4: memref<1xf32, #tpu.memory_space<smem>>, %arg5: memref<1x1x8xf32, #tpu.memory_space<vmem>>, %arg6: memref<1x1x8xf32, #tpu.memory_space<vmem>>) attributes {dimension_semantics = [#tpu.dimension_semantics<parallel>, #tpu.dimension_semantics<arbitrary>], iteration_bounds = array<i64: 1, 1>, scalar_prefetch = 0 : i64, scratch_operands = 1 : i64, tpu.core_type = #tpu.core_type<tc>, window_params = [{transform_indices = @transform_0, window_bounds = array<i64: 8, 32>}, {transform_indices = @transform_1, window_bounds = array<i64: 1, 32>}, {transform_indices = @transform_2, window_bounds = array<i64: 1>}, {transform_indices = @transform_3, window_bounds = array<i64: 1, 1, 8>}]} {
    %c0_i32 = arith.constant 0 : i32
    %0 = arith.cmpi eq, %arg1, %c0_i32 : i32
    %1 = arith.extui %0 : i1 to i32
    %c0_i32_0 = arith.constant 0 : i32
    %2 = arith.cmpi ne, %1, %c0_i32_0 : i32
    scf.if %2 {
      %cst_12 = arith.constant 0.000000e+00 : f32
      %15 = vector.broadcast %cst_12 : f32 to vector<1x1x8xf32>
      %c0_13 = arith.constant 0 : index
      %c0_14 = arith.constant 0 : index
      %c0_15 = arith.constant 0 : index
      %16 = vector.load %arg6[%c0_13, %c0_14, %c0_15] : memref<1x1x8xf32, #tpu.memory_space<vmem>>, vector<1x1x8xf32>
      tpu.vector_store %arg6[%c0_13, %c0_14, %c0_15], %15 {strides = array<i32>} : memref<1x1x8xf32, #tpu.memory_space<vmem>>, vector<1x1x8xf32>,
    } else {
    }
    %c0 = arith.constant 0 : index
    %c0_1 = arith.constant 0 : index
    %3 = vector.load %arg2[%c0, %c0_1] : memref<8x32xf32, #tpu.memory_space<vmem>>, vector<8x32xf32>
    %c0_2 = arith.constant 0 : index
    %c0_3 = arith.constant 0 : index
    %4 = vector.load %arg3[%c0_2, %c0_3] : memref<1x32xf32, #tpu.memory_space<vmem>>, vector<1x32xf32>
    %c0_4 = arith.constant 0 : index
    %c0_5 = arith.constant 0 : index
    %c0_6 = arith.constant 0 : index
    %5 = vector.load %arg6[%c0_4, %c0_5, %c0_6] : memref<1x1x8xf32, #tpu.memory_space<vmem>>, vector<1x1x8xf32>
    %6 = vector.broadcast %4 : vector<1x32xf32> to vector<8x32xf32>
    %7 = arith.mulf %3, %6 : vector<8x32xf32>
    %cst = arith.constant dense<0.000000e+00> : vector<8xf32>
    %8 = vector.multi_reduction <add>, %7, %cst [1] : vector<8x32xf32> to vector<8xf32>
    %9 = vector.shape_cast %8 : vector<8xf32> to vector<1x1x8xf32>
    %10 = arith.addf %5, %9 : vector<1x1x8xf32>
    %c0_7 = arith.constant 0 : index
    %c0_8 = arith.constant 0 : index
    %c0_9 = arith.constant 0 : index
    %11 = vector.load %arg6[%c0_7, %c0_8, %c0_9] : memref<1x1x8xf32, #tpu.memory_space<vmem>>, vector<1x1x8xf32>
    tpu.vector_store %arg6[%c0_7, %c0_8, %c0_9], %10 {strides = array<i32>} : memref<1x1x8xf32, #tpu.memory_space<vmem>>, vector<1x1x8xf32>,
    %c0_i32_10 = arith.constant 0 : i32
    %12 = arith.cmpi eq, %arg1, %c0_i32_10 : i32
    %13 = arith.extui %12 : i1 to i32
    %c0_i32_11 = arith.constant 0 : i32
    %14 = arith.cmpi ne, %13, %c0_i32_11 : i32
    scf.if %14 {
      %c0_12 = arith.constant 0 : index
      %c0_13 = arith.constant 0 : index
      %c0_14 = arith.constant 0 : index
      %15 = vector.load %arg6[%c0_12, %c0_13, %c0_14] : memref<1x1x8xf32, #tpu.memory_space<vmem>>, vector<1x1x8xf32>
      %c0_15 = arith.constant 0 : index
      %16 = memref.load %arg4[%c0_15] : memref<1xf32, #tpu.memory_space<smem>>
      %17 = vector.broadcast %16 : f32 to vector<1x1x8xf32>
      %18 = arith.addf %15, %17 : vector<1x1x8xf32>
      %19 = arith.negf %18 : vector<1x1x8xf32>
      %20 = math.exp %19 : vector<1x1x8xf32>
      %cst_16 = arith.constant 1.000000e+00 : f32
      %21 = vector.broadcast %cst_16 : f32 to vector<1x1x8xf32>
      %22 = arith.addf %21, %20 : vector<1x1x8xf32>
      %23 = arith.divf %21, %22 : vector<1x1x8xf32>
      %c0_17 = arith.constant 0 : index
      %c0_18 = arith.constant 0 : index
      %c0_19 = arith.constant 0 : index
      %24 = vector.load %arg5[%c0_17, %c0_18, %c0_19] : memref<1x1x8xf32, #tpu.memory_space<vmem>>, vector<1x1x8xf32>
      tpu.vector_store %arg5[%c0_17, %c0_18, %c0_19], %23 {strides = array<i32>} : memref<1x1x8xf32, #tpu.memory_space<vmem>>, vector<1x1x8xf32>,
    } else {
    }
    return
  }
  func.func @transform_0(%arg0: i32, %arg1: i32) -> (i32, i32) {
    %c0_i32 = arith.constant 0 : i32
    return %arg0, %arg1 : i32, i32
  }
  func.func @transform_1(%arg0: i32, %arg1: i32) -> (i32, i32) {
    %c0_i32 = arith.constant 0 : i32
    %c0_i32_0 = arith.constant 0 : i32
    return %c0_i32, %arg1 : i32, i32
  }
  func.func @transform_2(%arg0: i32, %arg1: i32) -> i32 {
    %c0_i32 = arith.constant 0 : i32
    %c0_i32_0 = arith.constant 0 : i32
    return %c0_i32 : i32
  }
  func.func @transform_3(%arg0: i32, %arg1: i32) -> (i32, i32, i32) {
    %c0_i32 = arith.constant 0 : i32
    %c0_i32_0 = arith.constant 0 : i32
    %c0_i32_1 = arith.constant 0 : i32
    return %arg0, %c0_i32, %c0_i32_0 : i32, i32, i32
  }
}

</mosaic_0001>

<bundles_post_ra>
// kernel: tpu_custom_call.1
= control target key start
LH: loop header
LB: loop body
LE: loop exit
PB: predicated region body
PF: predicated region fallthrough
CT: control target
= control target key end

     0   :  { %9 = vsyncpa [#allocation5], 0  ;;  %s304_s0 = inlined_call_operand.hbm [shape: f32[8,32], index: 0, kind: input, shape index: {}]   ;;  %s305_s1 = inlined_call_operand.vmem [shape: f32[1,32], index: 1, kind: input, shape index: {}]   ;;  %s306_s2 = inlined_call_operand.<no memory space> [shape: f32[1], index: 2, kind: input, shape index: {}]   ;;  %s307_s3 = inlined_call_operand.hbm [shape: f32[1,1,8], index: 3, kind: output, shape index: {}]  }
   0x1   :  { %10 = vsyncpa [#allocation6], 0  ;;  %s246_s12 = smov [#allocation4]   ;;  %s198_s16 = scalar_lea.hbm %s304_s0, 128 }
   0x2   :  { %s17_s13 = sshll.u32 %s246_s12, 4  ;;  %p199_p0 = scmp.ne.s32.totalorder %s304_s0, %s198_s16  ;;  %s18_s13 = int_to_ptr.vmem [resolvable:$true] %s17_s13 }
   0x3   :  { %p202_p1 = scmp.lt.u32.totalorder %s198_s16, %s304_s0 }
   0x5   :  { %p204_p2 = pnand %p202_p1, %p199_p0 }
   0x7   :  { %207 = shalt.err (!%p204_p2)
}
   0x8   :  { %s208_s21 = scalar_lea.vmem %s18_s13, 128  ;;  %p213_p4 = scmp.lt.s32.totalorder %s18_s13, %s18_s13 }
   0x9   :  { %p209_p3 = scmp.ne.s32.totalorder %s18_s13, %s208_s21  ;;  %p214_p5 = scmp.lt.s32.totalorder %s208_s21, %s208_s21 }
   0xb   :  { %p215_p6 = por %p214_p5, %p213_p4 }
   0xd   :  { %p216_p7 = pnand %p215_p6, %p209_p3 }
   0xf   :  { %219 = shalt.err (!%p216_p7)
}
  0x10   :  { %20 = dma.hbm_to_vmem [thread:$0]  %s304_s0, 128, %s18_s13, [#allocation5]  }
  0x11   :  { %242 = dma.done.wait [#allocation5], 128  }
  0x12   :  { %243 = vsyncadd [#allocation5], 4294967168  ;;  %v34_v0 = vld [vmem:[#allocation4] sm:$0xff]  ;;  %v186_v1 = vld [vmem:[%s305_s1] ss:$0 sm:$0xff]  ;;  %vm44_vm0 = vcmask 261120   ;;  %v49_v5 = vlaneseq  ;;  %v162_v50 = vstv %s306_s2 }
  0x13   :  { %v43_v2 = vmul.f32 %v186_v1, %v34_v0  ;;  %v247_v4 = vmov 0   ;;  %v248_v9 = vmov 1966171168   ;;  %vm32_vm1 = vcmask 57344   ;;  %s250_s26 = smov [#allocation7]  }
  0x14   :  { %193 = vset.pattern.permute.xlu0 %v247_v4  ;;  %v50_v6 = vshrl.u32 %v49_v5, 7  ;;  %v134_v7 = vand.u32 127, %v49_v5  ;;  %v86_v10 = vunpack.c.l.s4 %v248_v9  ;;  %v249_v43 = vmov 0.0   ;;  %s177_s27 = sshll.u32 %s250_s26, 4  ;;  %s178_s27 = int_to_ptr.vmem [resolvable:$true] %s177_s27 }
  0x15   :  { %v45_v3 = vsel %vm44_vm0, %v43_v2, 0.0  ;;  %33 = vst.msk [vmem:[#allocation2] sm:$0x1] %vm32_vm1, %v249_v43  ;;  %s220_s28 = scalar_lea.vmem %s178_s27, 16  ;;  %s224_s29 = scalar_lea.vmem %s178_s27, 32 }
  0x16   :  { %46 = vadd.xlane.f32.xlu0 %v45_v3  ;;  %v137_v8 = vsub.s32 %v134_v7, %v50_v6  ;;  %v87_v11 = vunpack.c.0.s8 %v86_v10  ;;  %v51_v12 = vsub.s32 0, %v50_v6  ;;  %v55_v13 = vsub.s32 1, %v50_v6  ;;  %p221_p8 = scmp.ne.s32.totalorder %s178_s27, %s220_s28  ;;  %p225_p9 = scmp.lt.s32.totalorder %s178_s27, %s178_s27 }
  0x17   :  { %v59_v14 = vsub.s32 2, %v50_v6  ;;  %v63_v15 = vsub.s32 3, %v50_v6  ;;  %v67_v16 = vsub.s32 4, %v50_v6  ;;  %v71_v17 = vsub.s32 5, %v50_v6  ;;  %p226_p10 = scmp.lt.s32.totalorder %s224_s29, %s220_s28 }
  0x18   :  { %v75_v18 = vsub.s32 6, %v50_v6  ;;  %v79_v19 = vsub.s32 7, %v50_v6  ;;  %v90_v21 = vsub.s32 %v87_v11, %v50_v6 }
  0x19   :  { %p227_p11 = por %p226_p10, %p225_p9 }
  0x1b   :  { %p228_p12 = pnand %p227_p11, %p221_p8 }
  0x1c   :  { %v36_v47 = vld [vmem:[#allocation2] sm:$0x1] }
  0xa3   :  { %v47_v20 = vpop.xlane.xlu0 %46 }
  0xa4   :  { %v52_v22 = vrot.slane %v47_v20, %v51_v12  ;;  %v56_v23 = vrot.slane %v47_v20, %v55_v13  ;;  %v60_v24 = vrot.slane %v47_v20, %v59_v14  ;;  %v64_v25 = vrot.slane %v47_v20, %v63_v15 }
  0xa5   :  { %v68_v26 = vrot.slane %v47_v20, %v67_v16  ;;  %v72_v27 = vrot.slane %v47_v20, %v71_v17  ;;  %v76_v28 = vrot.slane %v47_v20, %v75_v18  ;;  %v80_v29 = vrot.slane %v47_v20, %v79_v19 }
  0xa6   :  { %v81_v30 = vcombine.low %v52_v22, %v56_v23  ;;  %v82_v31 = vcombine.low %v60_v24, %v64_v25 }
  0xa7   :  { %v83_v32 = vcombine.low %v68_v26, %v72_v27  ;;  %v84_v33 = vcombine.low %v76_v28, %v80_v29 }
  0xa8   :  { %v91_v34 = vrot.slane %v81_v30, %v90_v21  ;;  %v98_v35 = vrot.slane %v82_v31, %v90_v21 }
  0xa9   :  { %v105_v36 = vrot.slane %v83_v32, %v90_v21  ;;  %v112_v37 = vrot.slane %v84_v33, %v90_v21 }
  0xaa   :  { %v113_v38 = vcombine.low %v91_v34, %v98_v35 }
  0xab   :  { %v114_v39 = vcombine.low %v105_v36, %v112_v37 }
  0xac   :  { %v121_v40 = vrot.slane %v113_v38, %v90_v21 }
  0xad   :  { %v128_v41 = vrot.slane %v114_v39, %v90_v21 }
  0xaf   :  { %v129_v42 = vcombine.low %v121_v40, %v128_v41 }
  0xb1   :  { %131 = vperm.xlu0 %193, %v129_v42  }
 0x130   :  { %v132_v44 = vpop.permute.xlu0 %131 }
 0x131   :  { %v138_v45 = vrot.slane %v132_v44, %v137_v8 }
 0x133   :  { %v145_v46 = vrot.slane %v138_v45, %v90_v21 }
 0x135   :  { %v152_v48 = vrot.slane %v145_v46, %v90_v21 }
 0x137   :  { %v154_v49 = vadd.f32 %v152_v48, %v36_v47 }
 0x139   :  { %156 = vst.msk [vmem:[#allocation2] sm:$0x1] %vm32_vm1, %v154_v49 }
 0x140   :  { %v160_v51 = vld [vmem:[#allocation2] sm:$0x1] }
 0x141   :  { %v163_v52 = vadd.f32 %v162_v50, %v160_v51 }
 0x143   :  { %v187_v53 = vmul.f32 -1.442695, %v163_v52 }
 0x145   :  { %194 = vpow2.f32 %v187_v53 }
 0x14f   :  { %v195_v54 = vpop.eup %194 }
 0x150   :  { %v167_v55 = vadd.f32 1.0, %v195_v54 }
 0x152   :  { %196 = vrcp.f32 %v167_v55 }
 0x15c   :  { %v197_v56 = vpop.eup %196 }
 0x15d   :  { %170 = vst.msk [vmem:[#allocation7] sm:$0x1] %vm32_vm1, %v197_v56 }
 0x15e   :  { %231 = shalt.err (!%p228_p12)
}
 0x15f   :  { %s232_s4 = scalar_lea.hbm %s307_s3, 16 }
 0x160   :  { %p233_p13 = scmp.ne.s32.totalorder %s307_s3, %s232_s4  ;;  %p236_p0 = scmp.lt.u32.totalorder %s232_s4, %s307_s3 }
 0x162   :  { %p238_p1 = pnand %p236_p0, %p233_p13 }
 0x164   :  { %241 = shalt.err (!%p238_p1)
}
 0x165   :  { %180 = dma.vmem_to_hbm [thread:$0]  %s178_s27, 16, %s307_s3, [#allocation6]  }
 0x166   :  { %244 = dma.done.wait [#allocation6], 16  }
 0x167   :  { %245 = vsyncadd [#allocation6], 4294967280 }
 0x168   :  { %184 = vsyncpa [#allocation5], 1 }
 0x169   :  { %185 = vsyncpa [#allocation6], 1 }

</bundles_post_ra>
